<compile_context>
chip_gen: v5e
topology: v5e:2x2
jax: 0.10.0
libtpu: 0.0.40
codegen_flags: <defaults>
</compile_context>

<pallas_src>
import jax
import jax.numpy as jnp
from jax.experimental import pallas as pl
from jax.experimental.pallas import tpu as pltpu


# ----------------------------------------------------------------------------
# Kernels
# ----------------------------------------------------------------------------
def _linear_kernel_inplace(x_ref, w_ref, b_ref, o_ref):
    """f32 output: accumulate directly into the resident output block."""
    k = pl.program_id(2)

    @pl.when(k == 0)
    def _():
        o_ref[...] = jnp.broadcast_to(
            b_ref[...].astype(o_ref.dtype), o_ref.shape
        )

    o_ref[...] += jnp.dot(
        x_ref[...], w_ref[...], preferred_element_type=jnp.float32
    )


def _linear_kernel_acc(x_ref, w_ref, b_ref, o_ref, acc_ref):
    """Non-f32 output: f32 scratch accumulator, single cast + bias at the end."""
    k = pl.program_id(2)

    @pl.when(k == 0)
    def _():
        acc_ref[...] = jnp.zeros_like(acc_ref)

    acc_ref[...] += jnp.dot(
        x_ref[...], w_ref[...], preferred_element_type=jnp.float32
    )

    @pl.when(k == pl.num_programs(2) - 1)
    def _():
        o_ref[...] = (
            acc_ref[...] + b_ref[...].astype(jnp.float32)
        ).astype(o_ref.dtype)


# ----------------------------------------------------------------------------
# Tiling helpers
# ----------------------------------------------------------------------------
def _round_up(x, m):
    return ((x + m - 1) // m) * m


def _sublane(dtype):
    # Minimum second-to-last tile dim per dtype packing.
    return {4: 8, 2: 16, 1: 32}[jnp.dtype(dtype).itemsize]


def _pick_tile(dim, cap, gran):
    """Largest multiple of `gran` that divides `dim` (a multiple of gran) and is <= cap."""
    cap = min(cap, dim)
    t = (cap // gran) * gran
    while t > gran and dim % t != 0:
        t -= gran
    return max(t, gran)


def _tpu_config():
    kind = jax.devices()[0].device_kind.lower()
    if "v7" in kind:
        # 64 MiB VMEM, 3.2 TB/s HBM: moderate tiles, deep pipeline.
        return dict(tmn_cap=512, tk_cap=1024, vmem_cap=48 << 20, cores=2)
    if "v6" in kind:
        return dict(tmn_cap=512, tk_cap=2048, vmem_cap=96 << 20, cores=1)
    if "v5 lite" in kind or "v5e" in kind or "v5lite" in kind:
        # Most memory-bound generation: big tiles, raised scoped-VMEM limit.
        return dict(tmn_cap=512, tk_cap=2048, vmem_cap=96 << 20, cores=1)
    # Unknown / other generations: safe middle ground.
    return dict(tmn_cap=512, tk_cap=1024, vmem_cap=48 << 20, cores=1)


# ----------------------------------------------------------------------------
# Wrapper
# ----------------------------------------------------------------------------
def linear(x, weight, bias):
    """x: (M, K), weight: (K, N), bias: (N,) -> (M, N) = x @ weight + bias."""
    M, K = x.shape
    K2, N = weight.shape
    assert K == K2 and bias.shape == (N,)

    cfg = _tpu_config()
    sub = _sublane(x.dtype)

    # ---- M tiling: full-dim block when it fits (no padding at all).
    if M <= cfg["tmn_cap"]:
        tm, Mp = M, M
    else:
        Mp = _round_up(M, sub)
        tm = _pick_tile(Mp, cfg["tmn_cap"], sub)

    # ---- K tiling (explicit zero padding only when K must be split).
    if K <= cfg["tk_cap"]:
        tk, Kp = K, K
    else:
        Kp = _round_up(K, 128)
        tk = _pick_tile(Kp, cfg["tk_cap"], 128)

    # ---- N tiling.
    if N <= cfg["tmn_cap"]:
        tn, Np = N, N
    else:
        Np = _round_up(N, 128)
        tn = _pick_tile(Np, cfg["tmn_cap"], 128)

    # ---- Guarantee >=2 parallel output blocks on 2-TC chips (v7x).
    if cfg["cores"] > 1 and (Mp // tm) * (Np // tn) < 2:
        if tn % 256 == 0 and Np % (tn // 2) == 0:
            tn //= 2
        elif tm % (2 * sub) == 0 and Mp % (tm // 2) == 0:
            tm //= 2

    # ---- Minimal padding, only on the dims that actually need it.
    #      (For a real model, weight/bias padding belongs at parameter init;
    #       at the demo shapes below no padding happens at all.)
    x_p = x if (Mp == M and Kp == K) else jnp.pad(x, ((0, Mp - M), (0, Kp - K)))
    w_p = (
        weight
        if (Kp == K and Np == N)
        else jnp.pad(weight, ((0, Kp - K), (0, Np - N)))
    )
    b_p = (bias if Np == N else jnp.pad(bias, (0, Np - N))).reshape(1, Np)

    grid = (Mp // tm, Np // tn, Kp // tk)
    gm, gn, gk = grid

    out_dtype = x.dtype
    x_b = jnp.dtype(x.dtype).itemsize
    w_b = jnp.dtype(weight.dtype).itemsize
    o_b = jnp.dtype(out_dtype).itemsize

    acc_inplace = jnp.dtype(out_dtype) == jnp.float32
    if acc_inplace:
        kernel = _linear_kernel_inplace
        scratch_shapes = []
        acc_bytes = 0
    else:
        kernel = _linear_kernel_acc
        scratch_shapes = [pltpu.VMEM((tm, tn), jnp.float32)]
        acc_bytes = tm * tn * 4

    # Double-buffered input/output tiles + accumulator + headroom.
    vmem_needed = (
        2 * tm * tk * x_b
        + 2 * tk * tn * w_b
        + 2 * tn * w_b
        + 2 * tm * tn * o_b
        + acc_bytes
    )
    vmem_limit = int(min(cfg["vmem_cap"], max(vmem_needed + (8 << 20), 32 << 20)))

    # Actual HBM traffic: X is re-read once per N-block, W once per M-block.
    cost = pl.CostEstimate(
        flops=2 * Mp * Np * Kp,
        transcendentals=0,
        bytes_accessed=(
            gn * Mp * Kp * x_b
            + gm * Kp * Np * w_b
            + gm * Np * w_b
            + Mp * Np * o_b
        ),
    )

    out_p = pl.pallas_call(
        kernel,
        out_shape=jax.ShapeDtypeStruct((Mp, Np), out_dtype),
        grid=grid,
        in_specs=[
            pl.BlockSpec((tm, tk), lambda i, j, k: (i, k)),
            pl.BlockSpec((tk, tn), lambda i, j, k: (k, j)),
            pl.BlockSpec((1, tn), lambda i, j, k: (0, j)),
        ],
        out_specs=pl.BlockSpec((tm, tn), lambda i, j, k: (i, j)),
        scratch_shapes=scratch_shapes,
        compiler_params=pltpu.CompilerParams(
            dimension_semantics=("parallel", "parallel", "arbitrary"),
            vmem_limit_bytes=vmem_limit,
        ),
        cost_estimate=cost,
    )(x_p, w_p, b_p)

    if Mp == M and Np == N:
        return out_p
    return out_p[:M, :N]


# ----------------------------------------------------------------------------
# Demo / self-check
# ----------------------------------------------------------------------------
def kaiming_uniform(key, shape, dtype=jnp.float32):
    # torch.nn.init.kaiming_uniform_ defaults (a=0 -> gain=sqrt(2),
    # fan_in = shape[0] for an (in_features, out_features) tensor).
    fan_in = shape[0]
    gain = jnp.sqrt(2.0)
    bound = gain * jnp.sqrt(3.0 / fan_in)
    return jax.random.uniform(key, shape, dtype, minval=-bound, maxval=bound)


if __name__ == "__main__":
    linear_jit = jax.jit(linear)

    # --- Small shape matching the module spec (single-tile path). -----------
    in_features, out_features, batch = 32, 64, 8
    key = jax.random.PRNGKey(0)
    kx, kw, kb = jax.random.split(key, 3)

    x = jax.random.normal(kx, (batch, in_features), dtype=jnp.float32)
    weight = kaiming_uniform(kw, (in_features, out_features))
    bias = jax.random.normal(kb, (out_features,), dtype=jnp.float32)

    out = jax.block_until_ready(linear_jit(x, weight, bias))
    ref = x @ weight + bias
    assert out.shape == (batch, out_features)
    assert jnp.allclose(out, ref, atol=1e-5, rtol=1e-5)

    # --- Modest larger shape exercising the tiled / multi-k / padded path. --
    M2, K2, N2 = 520, 2560, 640
    k2x, k2w, k2b = jax.random.split(jax.random.PRNGKey(1), 3)
    x2 = jax.random.normal(k2x, (M2, K2), dtype=jnp.float32)
    w2 = kaiming_uniform(k2w, (K2, N2))
    b2 = jax.random.normal(k2b, (N2,), dtype=jnp.float32)

    out2 = jax.block_until_ready(linear_jit(x2, w2, b2))
    ref2 = x2 @ w2 + b2
    assert out2.shape == (M2, N2)
    # Looser tolerance: k-blocked f32 accumulation order differs from XLA's.
    assert jnp.allclose(out2, ref2, atol=2e-2, rtol=2e-2)

    print("KERNEL_OK")
</pallas_src>

<mosaic_0001>
module attributes {stable_mosaic.version = 11 : i64} {
  func.func @_linear_kernel_inplace(%arg0: i32, %arg1: i32, %arg2: i32, %arg3: memref<8x32xf32, #tpu.memory_space<vmem>>, %arg4: memref<32x64xf32, #tpu.memory_space<vmem>>, %arg5: memref<1x64xf32, #tpu.memory_space<vmem>>, %arg6: memref<8x64xf32, #tpu.memory_space<vmem>>) attributes {dimension_semantics = [#tpu.dimension_semantics<parallel>, #tpu.dimension_semantics<parallel>, #tpu.dimension_semantics<arbitrary>], iteration_bounds = array<i64: 1, 1, 1>, scalar_prefetch = 0 : i64, scratch_operands = 0 : i64, tpu.core_type = #tpu.core_type<tc>, window_params = [{transform_indices = @transform_0, window_bounds = array<i64: 8, 32>}, {transform_indices = @transform_1, window_bounds = array<i64: 32, 64>}, {transform_indices = @transform_2, window_bounds = array<i64: 1, 64>}, {transform_indices = @transform_3, window_bounds = array<i64: 8, 64>}]} {
    %c0_i32 = arith.constant 0 : i32
    %0 = arith.cmpi eq, %arg2, %c0_i32 : i32
    %1 = arith.extui %0 : i1 to i32
    %c0_i32_0 = arith.constant 0 : i32
    %2 = arith.cmpi ne, %1, %c0_i32_0 : i32
    scf.if %2 {
      %c0_8 = arith.constant 0 : index
      %c0_9 = arith.constant 0 : index
      %9 = vector.load %arg5[%c0_8, %c0_9] : memref<1x64xf32, #tpu.memory_space<vmem>>, vector<1x64xf32>
      %10 = vector.shape_cast %9 : vector<1x64xf32> to vector<1x64xf32>
      %11 = vector.broadcast %10 : vector<1x64xf32> to vector<8x64xf32>
      %c0_10 = arith.constant 0 : index
      %c0_11 = arith.constant 0 : index
      %12 = vector.load %arg6[%c0_10, %c0_11] : memref<8x64xf32, #tpu.memory_space<vmem>>, vector<8x64xf32>
      tpu.vector_store %arg6[%c0_10, %c0_11], %11 {strides = array<i32>} : memref<8x64xf32, #tpu.memory_space<vmem>>, vector<8x64xf32>,
    } else {
    }
    %c0 = arith.constant 0 : index
    %c0_1 = arith.constant 0 : index
    %3 = vector.load %arg6[%c0, %c0_1] : memref<8x64xf32, #tpu.memory_space<vmem>>, vector<8x64xf32>
    %c0_2 = arith.constant 0 : index
    %c0_3 = arith.constant 0 : index
    %4 = vector.load %arg3[%c0_2, %c0_3] : memref<8x32xf32, #tpu.memory_space<vmem>>, vector<8x32xf32>
    %c0_4 = arith.constant 0 : index
    %c0_5 = arith.constant 0 : index
    %5 = vector.load %arg4[%c0_4, %c0_5] : memref<32x64xf32, #tpu.memory_space<vmem>>, vector<32x64xf32>
    %cst = arith.constant dense<0.000000e+00> : vector<8x64xf32>
    %6 = tpu.matmul %4, %5, %cst {dimension_numbers = #tpu.dot_dimension_numbers<[1], [0], [0], [1], [0, 0, 1, 1], [], []>} : vector<8x32xf32>, vector<32x64xf32>, vector<8x64xf32> -> vector<8x64xf32>
    %7 = arith.addf %3, %6 : vector<8x64xf32>
    %c0_6 = arith.constant 0 : index
    %c0_7 = arith.constant 0 : index
    %8 = vector.load %arg6[%c0_6, %c0_7] : memref<8x64xf32, #tpu.memory_space<vmem>>, vector<8x64xf32>
    tpu.vector_store %arg6[%c0_6, %c0_7], %7 {strides = array<i32>} : memref<8x64xf32, #tpu.memory_space<vmem>>, vector<8x64xf32>,
    return
  }
  func.func @transform_0(%arg0: i32, %arg1: i32, %arg2: i32) -> (i32, i32) {
    %c0_i32 = arith.constant 0 : i32
    return %arg0, %arg2 : i32, i32
  }
  func.func @transform_1(%arg0: i32, %arg1: i32, %arg2: i32) -> (i32, i32) {
    %c0_i32 = arith.constant 0 : i32
    return %arg2, %arg1 : i32, i32
  }
  func.func @transform_2(%arg0: i32, %arg1: i32, %arg2: i32) -> (i32, i32) {
    %c0_i32 = arith.constant 0 : i32
    %c0_i32_0 = arith.constant 0 : i32
    return %c0_i32, %arg1 : i32, i32
  }
  func.func @transform_3(%arg0: i32, %arg1: i32, %arg2: i32) -> (i32, i32) {
    %c0_i32 = arith.constant 0 : i32
    return %arg0, %arg1 : i32, i32
  }
}

</mosaic_0001>

<bundles_post_ra>
// kernel: linear.1
= control target key start
LH: loop header
LB: loop body
LE: loop exit
PB: predicated region body
PF: predicated region fallthrough
CT: control target
= control target key end

     0   :  { %8 = vsyncpa [#allocation3], 0  ;;  %s230_s0 = inlined_call_operand.hbm [shape: f32[8,32], index: 0, kind: input, shape index: {}]   ;;  %s231_s1 = inlined_call_operand.hbm [shape: f32[32,64], index: 1, kind: input, shape index: {}]   ;;  %s232_s2 = inlined_call_operand.vmem [shape: f32[1,64], index: 2, kind: input, shape index: {}]   ;;  %s233_s3 = inlined_call_operand.hbm [shape: f32[8,64], index: 3, kind: output, shape index: {}]  }
   0x1   :  { %9 = vsyncpa [#allocation6], 0 }
   0x2   :  { %10 = vsyncpa [#allocation4], 0  ;;  %s16_s14 = sshll.u32 %s230_s0, 4  ;;  %s191_s15 = smov [#allocation2]   ;;  %s17_s14 = int_to_ptr.hbm [resolvable:$true] %s16_s14 }
   0x3   :  { %s18_s16 = sshll.u32 %s191_s15, 4  ;;  %s26_s19 = sshll.u32 %s231_s1, 4  ;;  %s19_s16 = int_to_ptr.vmem [resolvable:$true] %s18_s16  ;;  %s27_s19 = int_to_ptr.hbm [resolvable:$true] %s26_s19 }
   0x4   :  { %21 = dma.hbm_to_vmem [thread:$0]  %s17_s14, 128, %s19_s16, [#allocation3]  }
   0x5   :  { %s192_s20 = smov [#allocation5]   ;;  %s193_s22 = smov 128  }
   0x6   :  { %s28_s21 = sshll.u32 %s192_s20, 4  ;;  %s194_s23 = smov 8   ;;  %s29_s21 = int_to_ptr.vmem [resolvable:$true] %s28_s21 }
   0x7   :  { %34 = dma.hbm_to_vmem [thread:$0]  %s27_s19, 512, %s29_s21, [#allocation6], %s193_s22, %s193_s22, %s194_s23  }
   0x8   :  { %185 = dma.done.wait [#allocation3], 128  }
   0x9   :  { %186 = vsyncadd [#allocation3], 4294967168 }
   0xa   :  { %187 = dma.done.wait [#allocation6], 512  }
   0xb   :  { %188 = vsyncadd [#allocation6], 4294966784  ;;  %vm53_vm0 = vcmask 523264   ;;  %v112_v0 = vld [vmem:[%s232_s2] ss:$0 sm:$0xff]  ;;  %v59_v2 = vld [vmem:[#allocation5 + $0x10] sm:$0xff] }
   0xc   :  { %v60_v1 = vld [vmem:[#allocation5 + $0x18] sm:$0xff]  ;;  %54 = vst.msk [vmem:[#allocation7] sm:$0xff] %vm53_vm0, %v112_v0  ;;  %v58_v3 = vld [vmem:[#allocation5 + $0x8] sm:$0xff]  ;;  %v57_v4 = vld [vmem:[#allocation5] sm:$0xff]  ;;  %vm61_vm1 = vcmask 261120   ;;  %s195_s1 = smov [#allocation7]  }
   0xd   :  { %77 = vmatpush.msra.mxu0 %v60_v1  ;;  %v56_v5 = vld [vmem:[#allocation2] sm:$0xff]  ;;  %s93_s25 = sshll.u32 %s195_s1, 4  ;;  %s95_s2 = sshll.u32 %s233_s3, 4  ;;  %s94_s25 = int_to_ptr.vmem [resolvable:$true] %s93_s25  ;;  %s96_s2 = int_to_ptr.hbm [resolvable:$true] %s95_s2 }
   0xf   :  { %78 = vmatpush.msra.mxu0 %v59_v2 }
  0x11   :  { %79 = vmatpush.msra.mxu0 %v58_v3 }
  0x13   :  { %80 = vmatpush.msra.mxu0 %v57_v4  ;;  %v55_v6 = vld [vmem:[#allocation7] sm:$0xff] }
  0x14   :  { %106 = vmatmul.msk.f32.vlgmr.msra.gmra.mxu0 %vm61_vm1, %v56_v5 }
  0x91   :  { %v82_v7 = vpop.f32.mrf.mxu0 }
  0x92   :  { %v85_v8 = vadd.f32 %v82_v7, %v55_v6 }
  0x94   :  { %87 = vst.msk [vmem:[#allocation7] sm:$0xff] %vm53_vm0, %v85_v8 }
  0x95   :  { %98 = dma.vmem_to_hbm [thread:$0]  %s94_s25, 128, %s96_s2, [#allocation4]  }
  0x96   :  { %189 = dma.done.wait [#allocation4], 128  }
  0x97   :  { %190 = vsyncadd [#allocation4], 4294967168 }
  0x98   :  { %103 = vsyncpa [#allocation3], 1 }
  0x99   :  { %104 = vsyncpa [#allocation6], 1 }
  0x9a   :  { %105 = vsyncpa [#allocation4], 1 }

</bundles_post_ra>
